<compile_context>
chip_gen: v6e
topology: v6e:2x2x1
jax: 0.10.0
libtpu: 0.0.40
codegen_flags: <defaults>
</compile_context>

<pallas_src>
import functools
import math

import jax
import jax.numpy as jnp
from jax.experimental import pallas as pl
from jax.experimental.pallas import tpu as pltpu


def mha_kernel(xq_ref, xk_ref, xv_ref, mask_ref,
               wq_ref, bq_ref, wk_ref, bk_ref, wv_ref, bv_ref,
               wo_ref, bo_ref,
               o_ref, acc_ref, *, scale):
    h = pl.program_id(2)
    nh = pl.num_programs(2)

    @pl.when(h == 0)
    def _init():
        acc_ref[...] = jnp.zeros_like(acc_ref)

    f32 = jnp.float32
    bf16 = jnp.bfloat16

    xq = xq_ref[0]            # (Tq, D)  bf16
    xk = xk_ref[0]            # (Skv, D) bf16
    xv = xv_ref[0]            # (Skv, D) bf16
    mask = mask_ref[0]        # (1, Skv) int32, 0 => masked out

    # Per-head projections: contraction over the full d_model (MXU-friendly),
    # bf16 operands, f32 accumulation, f32 bias add.
    q = jnp.dot(xq, wq_ref[0], preferred_element_type=f32) + bq_ref[0]   # (Tq, dk)
    k = jnp.dot(xk, wk_ref[0], preferred_element_type=f32) + bk_ref[0]   # (Skv, dk)
    v = jnp.dot(xv, wv_ref[0], preferred_element_type=f32) + bv_ref[0]   # (Skv, dk)

    q = (q * scale).astype(bf16)   # fold 1/sqrt(dk) into q before QK^T
    k = k.astype(bf16)
    v = v.astype(bf16)

    # scores = q @ k^T  (2-D dot_general with transposed rhs; f32 accumulation)
    scores = jax.lax.dot_general(q, k, (((1,), (1,)), ((), ())),
                                 preferred_element_type=f32)             # (Tq, Skv)
    scores = scores + jnp.where(mask == 0, -1e9, 0.0).astype(f32)        # additive mask

    # softmax in f32
    m = jnp.max(scores, axis=-1, keepdims=True)
    e = jnp.exp(scores - m)
    probs = e * pl.reciprocal(jnp.sum(e, axis=-1, keepdims=True), approx=True)

    ctx = jnp.dot(probs.astype(bf16), v, preferred_element_type=f32)     # (Tq, dk)

    # This head's contribution to the output projection.  Summing
    # (Tq, dk) @ W_o[h*dk:(h+1)*dk, :] over heads == combine_heads + W_o.
    acc_ref[...] += jnp.dot(ctx.astype(bf16), wo_ref[0],
                            preferred_element_type=f32)                  # (Tq, D)

    @pl.when(h == nh - 1)
    def _finalize():
        o_ref[0] = (acc_ref[...] + bo_ref[...]).astype(o_ref.dtype)


def _pick_q_tile(seq_len):
    # prefer MXU-friendly 256 (v6e/v7x), then 128 (v5e); otherwise whole sequence.
    for t in (256, 128):
        if seq_len >= t and seq_len % t == 0:
            return t
    return seq_len


def multi_head_attention(q_in, k_in, v_in, mask, params, *, num_heads):
    """Pallas port of MultiHeadAttention.forward.

    q_in: (B, Sq, D); k_in, v_in: (B, Skv, D); mask: (B, 1, Skv) int (1=attend, 0=mask),
    broadcast over heads and query positions.  Returns (B, Sq, D) float32.
    """
    B, Sq, D = q_in.shape
    Skv = k_in.shape[1]
    assert D % num_heads == 0, "d_model must be divisible by num_heads"
    dk = D // num_heads
    scale = 1.0 / math.sqrt(dk)

    tq = _pick_q_tile(Sq)
    nq = Sq // tq
    bf16 = jnp.bfloat16

    # bf16 MXU operands (halves HBM / VMEM traffic).
    xq = q_in.astype(bf16)
    xk = k_in.astype(bf16)
    xv = v_in.astype(bf16)
    mask = mask.astype(jnp.int32)

    # Per-head weight layout (pure layout plumbing, done once in the wrapper):
    #   W_q/W_k/W_v: (D, D) -> (H, D, dk)   one head's output columns per block
    #   W_o        : (D, D) -> (H, dk, D)   one head's input rows per block
    wq = params["wq"].reshape(D, num_heads, dk).transpose(1, 0, 2).astype(bf16)
    wk = params["wk"].reshape(D, num_heads, dk).transpose(1, 0, 2).astype(bf16)
    wv = params["wv"].reshape(D, num_heads, dk).transpose(1, 0, 2).astype(bf16)
    wo = params["wo"].reshape(num_heads, dk, D).astype(bf16)
    bq = params["bq"].reshape(num_heads, 1, dk).astype(jnp.float32)
    bk = params["bk"].reshape(num_heads, 1, dk).astype(jnp.float32)
    bv = params["bv"].reshape(num_heads, 1, dk).astype(jnp.float32)
    bo = params["bo"].reshape(1, D).astype(jnp.float32)

    w_head_spec = pl.BlockSpec((1, D, dk), lambda b, qi, h: (h, 0, 0))
    b_head_spec = pl.BlockSpec((1, 1, dk), lambda b, qi, h: (h, 0, 0))

    in_specs = [
        pl.BlockSpec((1, tq, D), lambda b, qi, h: (b, qi, 0)),    # xq
        pl.BlockSpec((1, Skv, D), lambda b, qi, h: (b, 0, 0)),    # xk
        pl.BlockSpec((1, Skv, D), lambda b, qi, h: (b, 0, 0)),    # xv
        pl.BlockSpec((1, 1, Skv), lambda b, qi, h: (b, 0, 0)),    # mask
        w_head_spec, b_head_spec,                                 # wq, bq
        w_head_spec, b_head_spec,                                 # wk, bk
        w_head_spec, b_head_spec,                                 # wv, bv
        pl.BlockSpec((1, dk, D), lambda b, qi, h: (h, 0, 0)),     # wo
        pl.BlockSpec((1, D), lambda b, qi, h: (0, 0)),            # bo
    ]
    out_spec = pl.BlockSpec((1, tq, D), lambda b, qi, h: (b, qi, 0))

    # Explicit VMEM budget: double-buffered blocks + f32 accumulator + headroom.
    blk_bytes = (
        2 * tq * D * 2                       # xq (bf16, double-buffered)
        + 2 * 2 * Skv * D * 2                # xk, xv
        + 2 * Skv * 4                        # mask
        + 2 * 3 * (D * dk * 2 + dk * 4)      # wq/wk/wv + biases
        + 2 * (dk * D * 2) + D * 4           # wo + bo
        + 2 * tq * D * 4                     # output block
        + tq * D * 4                         # f32 accumulator scratch
    )
    vmem_limit = int(min(64 * 1024 * 1024, max(16 * 1024 * 1024, 2 * blk_bytes)))

    kernel = functools.partial(mha_kernel, scale=scale)

    return pl.pallas_call(
        kernel,
        out_shape=jax.ShapeDtypeStruct((B, Sq, D), jnp.float32),
        grid_spec=pltpu.PrefetchScalarGridSpec(
            num_scalar_prefetch=0,
            grid=(B, nq, num_heads),
            in_specs=in_specs,
            out_specs=out_spec,
            scratch_shapes=[pltpu.VMEM((tq, D), jnp.float32)],
        ),
        compiler_params=pltpu.CompilerParams(
            dimension_semantics=("parallel", "parallel", "arbitrary"),
            vmem_limit_bytes=vmem_limit,
        ),
    )(xq, xk, xv, mask, wq, bq, wk, bk, wv, bv, wo, bo)


def mha_reference(q_in, k_in, v_in, mask, params, *, num_heads):
    """Pure-JAX f32 reference matching the PyTorch module."""
    B, Sq, D = q_in.shape
    Skv = k_in.shape[1]
    dk = D // num_heads

    q = q_in @ params["wq"] + params["bq"]
    k = k_in @ params["wk"] + params["bk"]
    v = v_in @ params["wv"] + params["bv"]

    qh = q.reshape(B, Sq, num_heads, dk).transpose(0, 2, 1, 3)
    kh = k.reshape(B, Skv, num_heads, dk).transpose(0, 2, 1, 3)
    vh = v.reshape(B, Skv, num_heads, dk).transpose(0, 2, 1, 3)

    scores = jnp.einsum("bhqd,bhkd->bhqk", qh, kh) / math.sqrt(dk)
    scores = jnp.where(mask[:, :, None, :] == 0, -1e9, scores)
    probs = jax.nn.softmax(scores, axis=-1)
    ctx = jnp.einsum("bhqk,bhkd->bhqd", probs, vh)
    ctx = ctx.transpose(0, 2, 1, 3).reshape(B, Sq, D)
    return ctx @ params["wo"] + params["bo"]


def init_params(key, d_model):
    ks = jax.random.split(key, 8)
    sc = 0.02
    return {
        "wq": jax.random.normal(ks[0], (d_model, d_model), jnp.float32) * sc,
        "wk": jax.random.normal(ks[1], (d_model, d_model), jnp.float32) * sc,
        "wv": jax.random.normal(ks[2], (d_model, d_model), jnp.float32) * sc,
        "wo": jax.random.normal(ks[3], (d_model, d_model), jnp.float32) * sc,
        "bq": jax.random.normal(ks[4], (1, d_model), jnp.float32) * sc,
        "bk": jax.random.normal(ks[5], (1, d_model), jnp.float32) * sc,
        "bv": jax.random.normal(ks[6], (1, d_model), jnp.float32) * sc,
        "bo": jax.random.normal(ks[7], (1, d_model), jnp.float32) * sc,
    }


if __name__ == "__main__":
    # small demo shapes: d_model kept a multiple of 128 so activations/outputs are lane-dense.
    B, S, D, H = 2, 8, 128, 4

    key = jax.random.PRNGKey(0)
    kx, kp = jax.random.split(key)
    x = jax.random.normal(kx, (B, S, D), jnp.float32)

    # key-padding mask: (B, 1, S), 1 = attend, 0 = masked (integer -> exact == 0 test).
    lengths = jnp.array([S, 5], dtype=jnp.int32)
    mask = (jnp.arange(S)[None, :] < lengths[:, None]).astype(jnp.int32).reshape(B, 1, S)

    params = init_params(kp, D)

    y = multi_head_attention(x, x, x, mask, params, num_heads=H)   # self-attention
    jax.block_until_ready(y)

    y_ref = mha_reference(x, x, x, mask, params, num_heads=H)
    assert y.shape == (B, S, D) and y.dtype == jnp.float32
    err = float(jnp.max(jnp.abs(y - y_ref)))
    assert jnp.allclose(y, y_ref, atol=2e-2, rtol=2e-2), f"max abs err {err}"
    print("KERNEL_OK")
</pallas_src>

<mosaic_0001>
module attributes {stable_mosaic.version = 11 : i64} {
  func.func @mha_kernel(%arg0: i32, %arg1: i32, %arg2: i32, %arg3: memref<1x8x128xbf16, #tpu.memory_space<vmem>>, %arg4: memref<1x8x128xbf16, #tpu.memory_space<vmem>>, %arg5: memref<1x8x128xbf16, #tpu.memory_space<vmem>>, %arg6: memref<1x1x8xi32, #tpu.memory_space<vmem>>, %arg7: memref<1x128x32xbf16, #tpu.memory_space<vmem>>, %arg8: memref<1x1x32xf32, #tpu.memory_space<vmem>>, %arg9: memref<1x128x32xbf16, #tpu.memory_space<vmem>>, %arg10: memref<1x1x32xf32, #tpu.memory_space<vmem>>, %arg11: memref<1x128x32xbf16, #tpu.memory_space<vmem>>, %arg12: memref<1x1x32xf32, #tpu.memory_space<vmem>>, %arg13: memref<1x32x128xbf16, #tpu.memory_space<vmem>>, %arg14: memref<1x128xf32, #tpu.memory_space<vmem>>, %arg15: memref<1x8x128xf32, #tpu.memory_space<vmem>>, %arg16: memref<8x128xf32, #tpu.memory_space<vmem>>) attributes {dimension_semantics = [#tpu.dimension_semantics<parallel>, #tpu.dimension_semantics<parallel>, #tpu.dimension_semantics<arbitrary>], iteration_bounds = array<i64: 2, 1, 4>, scalar_prefetch = 0 : i64, scratch_operands = 1 : i64, tpu.core_type = #tpu.core_type<tc>, window_params = [{transform_indices = @transform_0, window_bounds = array<i64: 1, 8, 128>}, {transform_indices = @transform_1, window_bounds = array<i64: 1, 8, 128>}, {transform_indices = @transform_2, window_bounds = array<i64: 1, 8, 128>}, {transform_indices = @transform_3, window_bounds = array<i64: 1, 1, 8>}, {transform_indices = @transform_4, window_bounds = array<i64: 1, 128, 32>}, {transform_indices = @transform_5, window_bounds = array<i64: 1, 1, 32>}, {transform_indices = @transform_6, window_bounds = array<i64: 1, 128, 32>}, {transform_indices = @transform_7, window_bounds = array<i64: 1, 1, 32>}, {transform_indices = @transform_8, window_bounds = array<i64: 1, 128, 32>}, {transform_indices = @transform_9, window_bounds = array<i64: 1, 1, 32>}, {transform_indices = @transform_10, window_bounds = array<i64: 1, 32, 128>}, {pipeline_mode = #tpu.pipeline_mode<synchronous>, transform_indices = @transform_11, window_bounds = array<i64: 1, 128>}, {transform_indices = @transform_12, window_bounds = array<i64: 1, 8, 128>}]} {
    %c0_i32 = arith.constant 0 : i32
    %0 = arith.cmpi eq, %arg2, %c0_i32 : i32
    %1 = arith.extui %0 : i1 to i32
    %c0_i32_0 = arith.constant 0 : i32
    %2 = arith.cmpi ne, %1, %c0_i32_0 : i32
    scf.if %2 {
      %cst_49 = arith.constant 0.000000e+00 : f32
      %67 = vector.broadcast %cst_49 : f32 to vector<8x128xf32>
      %c0_50 = arith.constant 0 : index
      %c0_51 = arith.constant 0 : index
      %68 = vector.load %arg16[%c0_50, %c0_51] : memref<8x128xf32, #tpu.memory_space<vmem>>, vector<8x128xf32>
      tpu.vector_store %arg16[%c0_50, %c0_51], %67 {strides = array<i32>} : memref<8x128xf32, #tpu.memory_space<vmem>>, vector<8x128xf32>,
    } else {
    }
    %c0 = arith.constant 0 : index
    %c0_1 = arith.constant 0 : index
    %c0_2 = arith.constant 0 : index
    %3 = vector.load %arg3[%c0, %c0_1, %c0_2] : memref<1x8x128xbf16, #tpu.memory_space<vmem>>, vector<1x8x128xbf16>
    %4 = vector.shape_cast %3 : vector<1x8x128xbf16> to vector<8x128xbf16>
    %c0_3 = arith.constant 0 : index
    %c0_4 = arith.constant 0 : index
    %c0_5 = arith.constant 0 : index
    %5 = vector.load %arg4[%c0_3, %c0_4, %c0_5] : memref<1x8x128xbf16, #tpu.memory_space<vmem>>, vector<1x8x128xbf16>
    %6 = vector.shape_cast %5 : vector<1x8x128xbf16> to vector<8x128xbf16>
    %c0_6 = arith.constant 0 : index
    %c0_7 = arith.constant 0 : index
    %c0_8 = arith.constant 0 : index
    %7 = vector.load %arg5[%c0_6, %c0_7, %c0_8] : memref<1x8x128xbf16, #tpu.memory_space<vmem>>, vector<1x8x128xbf16>
    %8 = vector.shape_cast %7 : vector<1x8x128xbf16> to vector<8x128xbf16>
    %c0_9 = arith.constant 0 : index
    %c0_10 = arith.constant 0 : index
    %c0_11 = arith.constant 0 : index
    %9 = vector.load %arg6[%c0_9, %c0_10, %c0_11] : memref<1x1x8xi32, #tpu.memory_space<vmem>>, vector<1x1x8xi32>
    %10 = vector.shape_cast %9 : vector<1x1x8xi32> to vector<1x8xi32>
    %c0_12 = arith.constant 0 : index
    %c0_13 = arith.constant 0 : index
    %c0_14 = arith.constant 0 : index
    %11 = vector.load %arg7[%c0_12, %c0_13, %c0_14] : memref<1x128x32xbf16, #tpu.memory_space<vmem>>, vector<1x128x32xbf16>
    %12 = vector.shape_cast %11 : vector<1x128x32xbf16> to vector<128x32xbf16>
    %cst = arith.constant dense<0.000000e+00> : vector<8x32xf32>
    %13 = tpu.matmul %4, %12, %cst {dimension_numbers = #tpu.dot_dimension_numbers<[1], [0], [0], [1], [0, 0, 1, 1], [], []>} : vector<8x128xbf16>, vector<128x32xbf16>, vector<8x32xf32> -> vector<8x32xf32>
    %c0_15 = arith.constant 0 : index
    %c0_16 = arith.constant 0 : index
    %c0_17 = arith.constant 0 : index
    %14 = vector.load %arg8[%c0_15, %c0_16, %c0_17] : memref<1x1x32xf32, #tpu.memory_space<vmem>>, vector<1x1x32xf32>
    %15 = vector.shape_cast %14 : vector<1x1x32xf32> to vector<1x32xf32>
    %16 = vector.broadcast %15 : vector<1x32xf32> to vector<8x32xf32>
    %17 = arith.addf %13, %16 : vector<8x32xf32>
    %c0_18 = arith.constant 0 : index
    %c0_19 = arith.constant 0 : index
    %c0_20 = arith.constant 0 : index
    %18 = vector.load %arg9[%c0_18, %c0_19, %c0_20] : memref<1x128x32xbf16, #tpu.memory_space<vmem>>, vector<1x128x32xbf16>
    %19 = vector.shape_cast %18 : vector<1x128x32xbf16> to vector<128x32xbf16>
    %cst_21 = arith.constant dense<0.000000e+00> : vector<8x32xf32>
    %20 = tpu.matmul %6, %19, %cst_21 {dimension_numbers = #tpu.dot_dimension_numbers<[1], [0], [0], [1], [0, 0, 1, 1], [], []>} : vector<8x128xbf16>, vector<128x32xbf16>, vector<8x32xf32> -> vector<8x32xf32>
    %c0_22 = arith.constant 0 : index
    %c0_23 = arith.constant 0 : index
    %c0_24 = arith.constant 0 : index
    %21 = vector.load %arg10[%c0_22, %c0_23, %c0_24] : memref<1x1x32xf32, #tpu.memory_space<vmem>>, vector<1x1x32xf32>
    %22 = vector.shape_cast %21 : vector<1x1x32xf32> to vector<1x32xf32>
    %23 = vector.broadcast %22 : vector<1x32xf32> to vector<8x32xf32>
    %24 = arith.addf %20, %23 : vector<8x32xf32>
    %c0_25 = arith.constant 0 : index
    %c0_26 = arith.constant 0 : index
    %c0_27 = arith.constant 0 : index
    %25 = vector.load %arg11[%c0_25, %c0_26, %c0_27] : memref<1x128x32xbf16, #tpu.memory_space<vmem>>, vector<1x128x32xbf16>
    %26 = vector.shape_cast %25 : vector<1x128x32xbf16> to vector<128x32xbf16>
    %cst_28 = arith.constant dense<0.000000e+00> : vector<8x32xf32>
    %27 = tpu.matmul %8, %26, %cst_28 {dimension_numbers = #tpu.dot_dimension_numbers<[1], [0], [0], [1], [0, 0, 1, 1], [], []>} : vector<8x128xbf16>, vector<128x32xbf16>, vector<8x32xf32> -> vector<8x32xf32>
    %c0_29 = arith.constant 0 : index
    %c0_30 = arith.constant 0 : index
    %c0_31 = arith.constant 0 : index
    %28 = vector.load %arg12[%c0_29, %c0_30, %c0_31] : memref<1x1x32xf32, #tpu.memory_space<vmem>>, vector<1x1x32xf32>
    %29 = vector.shape_cast %28 : vector<1x1x32xf32> to vector<1x32xf32>
    %30 = vector.broadcast %29 : vector<1x32xf32> to vector<8x32xf32>
    %31 = arith.addf %27, %30 : vector<8x32xf32>
    %cst_32 = arith.constant 0.176776692 : f32
    %32 = vector.broadcast %cst_32 : f32 to vector<8x32xf32>
    %33 = arith.mulf %17, %32 : vector<8x32xf32>
    %34 = arith.truncf %33 : vector<8x32xf32> to vector<8x32xbf16>
    %35 = arith.truncf %24 : vector<8x32xf32> to vector<8x32xbf16>
    %36 = arith.truncf %31 : vector<8x32xf32> to vector<8x32xbf16>
    %cst_33 = arith.constant dense<0.000000e+00> : vector<8x8xf32>
    %37 = tpu.matmul %34, %35, %cst_33 {dimension_numbers = #tpu.dot_dimension_numbers<[1], [1], [0], [0], [0, 0, 1, 0], [], []>} : vector<8x32xbf16>, vector<8x32xbf16>, vector<8x8xf32> -> vector<8x8xf32>
    %c0_i32_34 = arith.constant 0 : i32
    %38 = vector.broadcast %c0_i32_34 : i32 to vector<1x8xi32>
    %39 = arith.cmpi eq, %10, %38 : vector<1x8xi32>
    %cst_35 = arith.constant -1.000000e+09 : f32
    %cst_36 = arith.constant 0.000000e+00 : f32
    %40 = vector.broadcast %cst_35 : f32 to vector<1x8xf32>
    %41 = vector.broadcast %cst_36 : f32 to vector<1x8xf32>
    %42 = arith.select %39, %40, %41 : vector<1x8xi1>, vector<1x8xf32>
    %43 = vector.broadcast %42 : vector<1x8xf32> to vector<8x8xf32>
    %44 = arith.addf %37, %43 : vector<8x8xf32>
    %cst_37 = arith.constant dense<0xFF800000> : vector<8xf32>
    %45 = vector.multi_reduction <maximumf>, %44, %cst_37 [1] : vector<8x8xf32> to vector<8xf32>
    %46 = vector.shape_cast %45 : vector<8xf32> to vector<8x1xf32>
    %47 = vector.broadcast %46 : vector<8x1xf32> to vector<8x8xf32>
    %48 = arith.subf %44, %47 : vector<8x8xf32>
    %49 = math.exp %48 : vector<8x8xf32>
    %cst_38 = arith.constant dense<0.000000e+00> : vector<8xf32>
    %50 = vector.multi_reduction <add>, %49, %cst_38 [1] : vector<8x8xf32> to vector<8xf32>
    %51 = vector.shape_cast %50 : vector<8xf32> to vector<8x1xf32>
    %52 = tpu.reciprocal %51 {approx = true} : vector<8x1xf32> -> vector<8x1xf32>
    %53 = vector.broadcast %52 : vector<8x1xf32> to vector<8x8xf32>
    %54 = arith.mulf %49, %53 : vector<8x8xf32>
    %55 = arith.truncf %54 : vector<8x8xf32> to vector<8x8xbf16>
    %cst_39 = arith.constant dense<0.000000e+00> : vector<8x32xf32>
    %56 = tpu.matmul %55, %36, %cst_39 {dimension_numbers = #tpu.dot_dimension_numbers<[1], [0], [0], [1], [0, 0, 1, 1], [], []>} : vector<8x8xbf16>, vector<8x32xbf16>, vector<8x32xf32> -> vector<8x32xf32>
    %c0_40 = arith.constant 0 : index
    %c0_41 = arith.constant 0 : index
    %57 = vector.load %arg16[%c0_40, %c0_41] : memref<8x128xf32, #tpu.memory_space<vmem>>, vector<8x128xf32>
    %58 = arith.truncf %56 : vector<8x32xf32> to vector<8x32xbf16>
    %c0_42 = arith.constant 0 : index
    %c0_43 = arith.constant 0 : index
    %c0_44 = arith.constant 0 : index
    %59 = vector.load %arg13[%c0_42, %c0_43, %c0_44] : memref<1x32x128xbf16, #tpu.memory_space<vmem>>, vector<1x32x128xbf16>
    %60 = vector.shape_cast %59 : vector<1x32x128xbf16> to vector<32x128xbf16>
    %cst_45 = arith.constant dense<0.000000e+00> : vector<8x128xf32>
    %61 = tpu.matmul %58, %60, %cst_45 {dimension_numbers = #tpu.dot_dimension_numbers<[1], [0], [0], [1], [0, 0, 1, 1], [], []>} : vector<8x32xbf16>, vector<32x128xbf16>, vector<8x128xf32> -> vector<8x128xf32>
    %62 = arith.addf %57, %61 : vector<8x128xf32>
    %c0_46 = arith.constant 0 : index
    %c0_47 = arith.constant 0 : index
    %63 = vector.load %arg16[%c0_46, %c0_47] : memref<8x128xf32, #tpu.memory_space<vmem>>, vector<8x128xf32>
    tpu.vector_store %arg16[%c0_46, %c0_47], %62 {strides = array<i32>} : memref<8x128xf32, #tpu.memory_space<vmem>>, vector<8x128xf32>,
    %c3_i32 = arith.constant 3 : i32
    %64 = arith.cmpi eq, %arg2, %c3_i32 : i32
    %65 = arith.extui %64 : i1 to i32
    %c0_i32_48 = arith.constant 0 : i32
    %66 = arith.cmpi ne, %65, %c0_i32_48 : i32
    scf.if %66 {
      %c0_49 = arith.constant 0 : index
      %c0_50 = arith.constant 0 : index
      %67 = vector.load %arg16[%c0_49, %c0_50] : memref<8x128xf32, #tpu.memory_space<vmem>>, vector<8x128xf32>
      %c0_51 = arith.constant 0 : index
      %c0_52 = arith.constant 0 : index
      %68 = vector.load %arg14[%c0_51, %c0_52] : memref<1x128xf32, #tpu.memory_space<vmem>>, vector<1x128xf32>
      %69 = vector.broadcast %68 : vector<1x128xf32> to vector<8x128xf32>
      %70 = arith.addf %67, %69 : vector<8x128xf32>
      %c0_53 = arith.constant 0 : index
      %c0_54 = arith.constant 0 : index
      %c0_55 = arith.constant 0 : index
      %71 = vector.load %arg15[%c0_53, %c0_54, %c0_55] : memref<1x8x128xf32, #tpu.memory_space<vmem>>, vector<1x8x128xf32>
      %72 = vector.shape_cast %71 : vector<1x8x128xf32> to vector<8x128xf32>
      %73 = vector.shape_cast %70 : vector<8x128xf32> to vector<1x8x128xf32>
      tpu.vector_store %arg15[%c0_53, %c0_54, %c0_55], %73 {strides = array<i32>} : memref<1x8x128xf32, #tpu.memory_space<vmem>>, vector<1x8x128xf32>,
    } else {
    }
    return
  }
  func.func @transform_0(%arg0: i32, %arg1: i32, %arg2: i32) -> (i32, i32, i32) {
    %c0_i32 = arith.constant 0 : i32
    %c0_i32_0 = arith.constant 0 : i32
    return %arg0, %arg1, %c0_i32 : i32, i32, i32
  }
  func.func @transform_1(%arg0: i32, %arg1: i32, %arg2: i32) -> (i32, i32, i32) {
    %c0_i32 = arith.constant 0 : i32
    %c0_i32_0 = arith.constant 0 : i32
    %c0_i32_1 = arith.constant 0 : i32
    return %arg0, %c0_i32, %c0_i32_0 : i32, i32, i32
  }
  func.func @transform_2(%arg0: i32, %arg1: i32, %arg2: i32) -> (i32, i32, i32) {
    %c0_i32 = arith.constant 0 : i32
    %c0_i32_0 = arith.constant 0 : i32
    %c0_i32_1 = arith.constant 0 : i32
    return %arg0, %c0_i32, %c0_i32_0 : i32, i32, i32
  }
  func.func @transform_3(%arg0: i32, %arg1: i32, %arg2: i32) -> (i32, i32, i32) {
    %c0_i32 = arith.constant 0 : i32
    %c0_i32_0 = arith.constant 0 : i32
    %c0_i32_1 = arith.constant 0 : i32
    return %arg0, %c0_i32, %c0_i32_0 : i32, i32, i32
  }
  func.func @transform_4(%arg0: i32, %arg1: i32, %arg2: i32) -> (i32, i32, i32) {
    %c0_i32 = arith.constant 0 : i32
    %c0_i32_0 = arith.constant 0 : i32
    %c0_i32_1 = arith.constant 0 : i32
    return %arg2, %c0_i32, %c0_i32_0 : i32, i32, i32
  }
  func.func @transform_5(%arg0: i32, %arg1: i32, %arg2: i32) -> (i32, i32, i32) {
    %c0_i32 = arith.constant 0 : i32
    %c0_i32_0 = arith.constant 0 : i32
    %c0_i32_1 = arith.constant 0 : i32
    return %arg2, %c0_i32, %c0_i32_0 : i32, i32, i32
  }
  func.func @transform_6(%arg0: i32, %arg1: i32, %arg2: i32) -> (i32, i32, i32) {
    %c0_i32 = arith.constant 0 : i32
    %c0_i32_0 = arith.constant 0 : i32
    %c0_i32_1 = arith.constant 0 : i32
    return %arg2, %c0_i32, %c0_i32_0 : i32, i32, i32
  }
  func.func @transform_7(%arg0: i32, %arg1: i32, %arg2: i32) -> (i32, i32, i32) {
    %c0_i32 = arith.constant 0 : i32
    %c0_i32_0 = arith.constant 0 : i32
    %c0_i32_1 = arith.constant 0 : i32
    return %arg2, %c0_i32, %c0_i32_0 : i32, i32, i32
  }
  func.func @transform_8(%arg0: i32, %arg1: i32, %arg2: i32) -> (i32, i32, i32) {
    %c0_i32 = arith.constant 0 : i32
    %c0_i32_0 = arith.constant 0 : i32
    %c0_i32_1 = arith.constant 0 : i32
    return %arg2, %c0_i32, %c0_i32_0 : i32, i32, i32
  }
  func.func @transform_9(%arg0: i32, %arg1: i32, %arg2: i32) -> (i32, i32, i32) {
    %c0_i32 = arith.constant 0 : i32
    %c0_i32_0 = arith.constant 0 : i32
    %c0_i32_1 = arith.constant 0 : i32
    return %arg2, %c0_i32, %c0_i32_0 : i32, i32, i32
  }
  func.func @transform_10(%arg0: i32, %arg1: i32, %arg2: i32) -> (i32, i32, i32) {
    %c0_i32 = arith.constant 0 : i32
    %c0_i32_0 = arith.constant 0 : i32
    %c0_i32_1 = arith.constant 0 : i32
    return %arg2, %c0_i32, %c0_i32_0 : i32, i32, i32
  }
  func.func @transform_11(%arg0: i32, %arg1: i32, %arg2: i32) -> (i32, i32) {
    %c0_i32 = arith.constant 0 : i32
    %c0_i32_0 = arith.constant 0 : i32
    %c0_i32_1 = arith.constant 0 : i32
    return %c0_i32, %c0_i32_0 : i32, i32
  }
  func.func @transform_12(%arg0: i32, %arg1: i32, %arg2: i32) -> (i32, i32, i32) {
    %c0_i32 = arith.constant 0 : i32
    %c0_i32_0 = arith.constant 0 : i32
    return %arg0, %arg1, %c0_i32 : i32, i32, i32
  }
}

</mosaic_0001>

<bundles_post_ra>
// kernel: tpu_custom_call.1
= control target key start
LH: loop header
LB: loop body
LE: loop exit
PB: predicated region body
PF: predicated region fallthrough
CT: control target
= control target key end

     0   :  { %s2090_s0 = inlined_call_operand.vmem [shape: bf16[2,8,128], index: 0, kind: input, shape index: {}]   ;;  %s2091_s1 = inlined_call_operand.vmem [shape: bf16[2,8,128], index: 1, kind: input, shape index: {}]   ;;  %s2092_s2 = inlined_call_operand.vmem [shape: bf16[2,8,128], index: 2, kind: input, shape index: {}]   ;;  %s2093_s3 = inlined_call_operand.vmem [shape: s32[2,1,8], index: 3, kind: input, shape index: {}]   ;;  %s2094_s4 = inlined_call_operand.vmem [shape: bf16[4,128,32], index: 4, kind: input, shape index: {}]   ;;  %s2095_s5 = inlined_call_operand.vmem [shape: f32[4,1,32], index: 5, kind: input, shape index: {}]   ;;  %s2096_s6 = inlined_call_operand.vmem [shape: bf16[4,128,32], index: 6, kind: input, shape index: {}]   ;;  %s2097_s7 = inlined_call_operand.vmem [shape: f32[4,1,32], index: 7, kind: input, shape index: {}]   ;;  %s2098_s8 = inlined_call_operand.vmem [shape: bf16[4,128,32], index: 8, kind: input, shape index: {}]   ;;  %s2099_s9 = inlined_call_operand.vmem [shape: f32[4,1,32], index: 9, kind: input, shape index: {}]   ;;  %s2100_s10 = inlined_call_operand.vmem [shape: bf16[4,32,128], index: 10, kind: input, shape index: {}]   ;;  %s2101_s11 = inlined_call_operand.vmem [shape: f32[1,128], index: 11, kind: input, shape index: {}]   ;;  %s2102_s12 = inlined_call_operand.hbm [shape: f32[2,8,128], index: 12, kind: output, shape index: {}]  }
   0x1   :  { %2117 = sst [smem:[#allocation18_spill]] %s2093_s3 }
   0x2   :  { %2118 = sst [smem:[#allocation19_spill]] %s2094_s4 }
   0x3   :  { %2119 = sst [smem:[#allocation20_spill]] %s2101_s11 }
   0x4   :  { %2120 = sst [smem:[#allocation21_spill]] %s2102_s12 }
   0x5   :  { %17 = vsyncpa [#allocation4], 0 }
   0x6   :  { %19 = vsyncpa [#allocation4 + $0x1], 0  ;;  %s1791_s21 = smov 0   ;;  %s1793_s22 = smov 0  }
   0x7   :  { %s1795_s23 = smov 0   ;;  %s1797_s24 = smov 0  }
   0x8   :  { %s1799_s25 = smov 0   ;;  %s1801_s26 = smov 0  }
   0x9   :  { %s1803_s27 = smov 0   ;;  %s1805_s28 = smov 0  }
   0xa LB: > { %2121 = sst [smem:[#allocation6_spill]] %s1692_s21  ;;  %s1350_s29 = sadd.s32 4294967295, %s1720_s28   ;;  %s1720_s28 = sphi %s1805_s28, %s25_s28   ;;  %s1716_s27 = sphi %s1803_s27, %s2158_s27   ;;  %s1712_s26 = sphi %s1801_s26, %s2157_s26   ;;  %s1708_s25 = sphi %s1799_s25, %s2156_s25   ;;  %s1704_s24 = sphi %s1797_s24, %s2155_s24   ;;  %s1700_s23 = sphi %s1795_s23, %s2154_s23   ;;  %s1696_s22 = sphi %s1793_s22, %s2153_s22   ;;  %s1692_s21 = sphi %s1791_s21, %s2152_s21  }
   0xb   : > { %2122 = sst [smem:[#allocation7_spill]] %s1696_s22  ;;  %s1351_s30 = sadd.s32 4294967294, %s1720_s28  }
   0xc   : > { %2123 = sst [smem:[#allocation8_spill]] %s1700_s23  ;;  %s37_s13 = sadd.s32 1, %s1712_s26 }
   0xd   : > { %2124 = sst [smem:[#allocation9_spill]] %s1708_s25  ;;  %p38_p0 = scmp.ge.s32.totalorder %s37_s13, 4 }
   0xe   : > { %2125 = sst [smem:[#allocation10_spill]] %s1712_s26  ;;  %s44_s14 = sadd.s32 1, %s1716_s27 }
   0xf   : > { %2126 = sst [smem:[#allocation11_spill]] %s1716_s27  ;;  %p372_p1 = scmp.ne.s32.totalorder %s1700_s23, %s1696_s22 }
  0x10   : > { %2127 = sst [smem:[#allocation12_spill]] %s1720_s28  ;;  %p373_p2 = scmp.eq.s32.totalorder %s1350_s29, 7 }
  0x11   : > { %s2160_s13 = smov (%p38_p0, %s37_s13), 0  ;;  %s2162_s14 = smov (!%p38_p0, %s44_s14), %s1716_s27 }
  0x12   : > { %2128 = sst [smem:[#allocation13_spill]] %s2160_s13  ;;  %p1840_p3 = por %p373_p2, %p372_p1 }
  0x13   : > { %p378_p4 = scmp.ne.s32.totalorder %s1696_s22, %s1692_s21  ;;  %p46_p5 = scmp.ge.s32.totalorder %s2162_s14, 2 }
  0x14   : > { %s2129_s15 = scalar_select %p1840_p3, 1, 0 }
  0x15   : > { %p379_p6 = scmp.eq.s32.totalorder %s1351_s30, 7  ;;  %p1354_p7 = scmp.ge.s32.totalorder %s1720_s28, 1 }
  0x16   : > { %2130 = sst [smem:[#allocation14_spill]] %s2129_s15  ;;  %p480_p8 = scmp.lt.s32.totalorder %s1720_s28, 9 }
  0x17   : > { %s2164_s14 = smov (%p46_p5, %s2162_s14), 0  ;;  %p1850_p9 = por %p379_p6, %p378_p4 }
  0x18   : > { %2131 = sst [smem:[#allocation15_spill]] %s2164_s14  ;;  %p481_p10 = pnand %p1354_p7, %p480_p8 }
  0x19   : > { %s2132_s16 = scalar_select %p1850_p9, 1, 0 }
  0x1a   : > { %s357_s17 = ssub.s32 %s1716_s27, %s2164_s14  ;;  %s362_s18 = sadd.s32 1, %s1700_s23 }
  0x1b   : > { %2133 = sst [smem:[#allocation16_spill]] %s2132_s16  ;;  %p360_p11 = scmp.eq.s32.totalorder %s357_s17, 0 }
  0x1c   : > { %484 = sbr.rel (%p481_p10) target bundleno = 1219 (0x4c3), region = 68  ;;  %s2104_s20 = sand.u32 (!%p481_p10), 1, %s1696_s22  }
  0x1d   : > { %s1858_s19 = scalar_select %p360_p11, %s1700_s23, %s362_s18  }
  0x1e   : > { %p564_p12 = scmp.lt.s32.totalorder (!%p481_p10), %s1708_s25, 1  ;;  %s1864_s29 = sshll.u32 (!%p481_p10), %s2104_s20, 3 }
  0x1f   : > { %2134 = sst [smem:[#allocation17_spill]] %s1858_s19  ;;  %p582_p13 = scmp.lt.s32.totalorder (!%p481_p10), %s1704_s24, 3 }
  0x20   : > { %s2136_s4 = sld [smem:[#allocation19_spill]] (!%p481_p10)  ;;  %s563_s27 = scalar_lea.vmem (!%p481_p10), [#allocation3], %s1864_s29 }
  0x21   : > { %s1868_s30 = scalar_select %p564_p12, %s1708_s25, 1 }
  0x22   : > { %s1871_s17 = scalar_select %p582_p13, %s1704_s24, 3 }
  0x23   : > { %s1874_s18 = sshll.u32 %s1868_s30, 2  ;;  %p1367_p0 = scmp.ne.s32.totalorder %s1704_s24, 0 }
  0x24   : > { %s1406_s22 = sshll.u32 %s1871_s17, 6  ;;  %s597_s12 = scalar_lea.vmem %s2097_s7, %s1871_s17 }
  0x25   : > { %s1905_s19 = scalar_lea.vmem %s2096_s6, %s1406_s22  ;;  %s1914_s21 = scalar_lea.vmem %s2098_s8, %s1406_s22 }
  0x26   : > { %s1896_s13 = scalar_lea.vmem %s2136_s4, %s1406_s22  ;;  %s605_s4 = scalar_lea.vmem %s2099_s9, %s1871_s17 }
  0x27   : > { %s1409_s20 = sshll.u32 %s1871_s17, 4  ;;  %615 = sbr.rel (%p1367_p0) target bundleno = 46 (0x2e), region = 72 }
  0x28   : > { %s1924_s26 = scalar_lea.vmem %s2100_s10, %s1409_s20 }
  0x2c   : > { %v1722_v0 = vmov 0.0  }
  0x2d   : > { %616 = vst [vmem:[#allocation2] sm:$0xff] %v1722_v0 }
  0x2e PF: > { %v1598_v1 = vld [vmem:[%s1905_s19 + $0x38] sm:$0xff]   ;;  %v1723_v2 = vmov 0.0   ;;  %v1600_v4 = vld [vmem:[%s1905_s19 + $0x30] sm:$0xff]   ;;  %vm1724_vm0 = vmmov 0   ;;  %v1602_v6 = vld [vmem:[%s1905_s19 + $0x28] sm:$0xff]   ;;  %s2137_s15 = scalar_lea.vmem %s2091_s1, %s1874_s18  ;;  %s2138_s28 = scalar_lea.vmem %s2090_s0, %s1874_s18  ;;  %vm966_vm1 = vcmask 261120   ;;  %v961_v45 = vlaneseq }
  0x2f   : > { %1464 = vmatprep.subr.bf16.mxu1 %v1723_v2  ;;  %1444 = vmatprep.subr.bf16.mxu0 %v1723_v2  ;;  %v1599_v3 = vld [vmem:[%s1896_s13 + $0x38] sm:$0xff]   ;;  %v1601_v5 = vld [vmem:[%s1896_s13 + $0x30] sm:$0xff]   ;;  %v1603_v7 = vld [vmem:[%s1896_s13 + $0x28] sm:$0xff]   ;;  %s2139_s20 = scalar_lea.vmem %s2095_s5, %s1871_s17  ;;  %s2140_s3 = scalar_lea.vmem %s2092_s2, %s1874_s18  ;;  %vm1013_vm3 = vcmask 64512   ;;  %vm1029_vm4 = vcmask 1043456  }
  0x30   : > { %1465 = vmatpush3.bf16.msra.mxu1 %v1598_v1  ;;  %1480 = vmatprep.mubr.msk.bf16.mxu1 %vm1724_vm0, %v1723_v2  ;;  %v1604_v8 = vld [vmem:[%s1905_s19 + $0x20] sm:$0xff]   ;;  %v1606_v10 = vld [vmem:[%s1905_s19 + $0x18] sm:$0xff]   ;;  %v1608_v12 = vld [vmem:[%s1905_s19 + $0x10] sm:$0xff]   ;;  %s2141_s23 = sld [smem:[#allocation18_spill]]  ;;  %v962_v47 = vshrl.u32 %v961_v45, 7  ;;  %p1400_p1 = scmp.ne.s32.totalorder %s1704_s24, 3 }
  0x31   : > { %1445 = vmatpush3.bf16.msra.mxu0 %v1599_v3  ;;  %1466 = vmatprep.subr.bf16.mxu1 %v1723_v2  ;;  %v1605_v9 = vld [vmem:[%s1896_s13 + $0x20] sm:$0xff]   ;;  %v1607_v11 = vld [vmem:[%s1896_s13 + $0x18] sm:$0xff]   ;;  %v1609_v13 = vld [vmem:[%s1896_s13 + $0x10] sm:$0xff]   ;;  %s2143_s18 = sld [smem:[#allocation20_spill]] (!%p1400_p1) }
  0x32   : > { %1446 = vmatprep.subr.bf16.mxu0 %v1723_v2  ;;  %1460 = vmatprep.mubr.msk.bf16.mxu0 %vm1724_vm0, %v1723_v2  ;;  %v1610_v14 = vld [vmem:[%s1905_s19 + $0x8] sm:$0xff]   ;;  %v1612_v16 = vld [vmem:[%s1905_s19] sm:$0xff]   ;;  %v1614_v36 = vld [vmem:[%s1914_s21 + $0x38] sm:$0xff]   ;;  %v963_v48 = vsub.s32 0, %v962_v47 }
  0x33   : > { %v1611_v15 = vld [vmem:[%s1896_s13 + $0x8] sm:$0xff]   ;;  %v1613_v17 = vld [vmem:[%s1896_s13] sm:$0xff]   ;;  %v1615_v37 = vld [vmem:[%s1914_s21 + $0x30] sm:$0xff]  }
  0x34   : > { %1467 = vmatpush3.bf16.msra.mxu1 %v1600_v4  ;;  %v618_v18 = vld [vmem:[%s2137_s15] sm:$0xf]  ;;  %v1616_v38 = vld [vmem:[%s1914_s21 + $0x28] sm:$0xff]   ;;  %v1618_v40 = vld [vmem:[%s1914_s21 + $0x18] sm:$0xff]  }
  0x35   : > { %1447 = vmatpush3.bf16.msra.mxu0 %v1601_v5  ;;  %1468 = vmatprep.subr.bf16.mxu1 %v1723_v2  ;;  %v617_v19 = vld [vmem:[%s2138_s28] sm:$0xf]  ;;  %v1619_v41 = vld [vmem:[%s1914_s21 + $0x10] sm:$0xff]   ;;  %v1620_v42 = vld [vmem:[%s1914_s21 + $0x8] sm:$0xff]  }
  0x36   : > { %1448 = vmatprep.subr.bf16.mxu0 %v1723_v2  ;;  %v1377_v20 = vld [vmem:[%s597_s12] ss:$0 sm:$0xff]  ;;  %s2142_s16 = scalar_lea.vmem %s2141_s23, %s1868_s30 }
  0x37   : > { %v1368_v21 = vld [vmem:[%s2139_s20] ss:$0 sm:$0xff] }
  0x38   : > { %1469 = vmatpush3.bf16.msra.mxu1 %v1602_v6  ;;  %v1617_v39 = vld [vmem:[%s1914_s21 + $0x20] sm:$0xff]  }
  0x39   : > { %1449 = vmatpush3.bf16.msra.mxu0 %v1603_v7  ;;  %1470 = vmatprep.subr.bf16.mxu1 %v1723_v2  ;;  %v1621_v43 = vld [vmem:[%s1914_s21] sm:$0xff]  }
  0x3a   : > { %1450 = vmatprep.subr.bf16.mxu0 %v1723_v2  ;;  %v619_v44 = vld [vmem:[%s2140_s3] sm:$0xf] }
  0x3b   : > { %v620_v46 = vld [vmem:[%s2142_s16] sm:$0x1] }
  0x3c   : > { %1471 = vmatpush3.bf16.msra.mxu1 %v1604_v8  ;;  %vm958_vm2 = vcmp.eq.s32.totalorder %v620_v46, 0  ;;  %v1386_v62 = vld [vmem:[%s605_s4] ss:$0 sm:$0xff] }
  0x3d   : > { %1451 = vmatpush3.bf16.msra.mxu0 %v1605_v9  ;;  %1472 = vmatprep.subr.bf16.mxu1 %v1723_v2  ;;  %v959_v49 = vsel %vm958_vm2, -1e+09, %v1723_v2 }
  0x3e   : > { %1452 = vmatprep.subr.bf16.mxu0 %v1723_v2  ;;  %v964_v50 = vrot.slane %v959_v49, %v963_v48 }
  0x40   : > { %1473 = vmatpush3.bf16.msra.mxu1 %v1606_v10  ;;  %v1622_v10 = vld [vmem:[%s1924_s26 + $0x8] sm:$0xff]  }
  0x41   : > { %1453 = vmatpush3.bf16.msra.mxu0 %v1607_v11  ;;  %1474 = vmatprep.subr.bf16.mxu1 %v1723_v2 }
  0x42   : > { %1454 = vmatprep.subr.bf16.mxu0 %v1723_v2 }
  0x44   : > { %1475 = vmatpush3.bf16.msra.mxu1 %v1608_v12  ;;  %v1623_v12 = vld [vmem:[%s1924_s26] sm:$0xff]  }
  0x45   : > { %1455 = vmatpush3.bf16.msra.mxu0 %v1609_v13  ;;  %1476 = vmatprep.subr.bf16.mxu1 %v1723_v2 }
  0x46   : > { %1456 = vmatprep.subr.bf16.mxu0 %v1723_v2 }
  0x48   : > { %1477 = vmatpush3.bf16.msra.mxu1 %v1610_v14 }
  0x49   : > { %1457 = vmatpush3.bf16.msra.mxu0 %v1611_v15  ;;  %1478 = vmatprep.subr.bf16.mxu1 %v1723_v2 }
  0x4a   : > { %1458 = vmatprep.subr.bf16.mxu0 %v1723_v2 }
  0x4c   : > { %1479 = vmatpush3.bf16.msra.mxu1 %v1612_v16 }
  0x4d   : > { %1459 = vmatpush3.bf16.msra.mxu0 %v1613_v17  ;;  %1504 = vmatprep.subr.bf16.mxu1 %v1723_v2 }
  0x4e   : > { %1484 = vmatprep.subr.bf16.mxu0 %v1723_v2 }
  0x4f   : > { %1481 = vmatmul.mubr.bf16.vlgmr.msra.gmra.mxu1 %v618_v18  ;;  %v1073_v18 = vld [vmem:[#allocation2] sm:$0xff] }
  0x50   : > { %1461 = vmatmul.mubr.bf16.vlgmr.msra.gmra.mxu0 %v617_v19  ;;  %1506 = vmatprep.mubr.msk.bf16.mxu1 %vm1724_vm0, %v1723_v2 }
  0x51   : > { %1500 = vmatprep.mubr.msk.bf16.mxu0 %vm1724_vm0, %v1723_v2  ;;  %1485 = vmatpush3.bf16.msra.mxu0 %v1614_v36 }
  0x52   : > { %1486 = vmatprep.subr.bf16.mxu0 %v1723_v2 }
  0x55   : > { %1487 = vmatpush3.bf16.msra.mxu0 %v1615_v37 }
  0x56   : > { %1488 = vmatprep.subr.bf16.mxu0 %v1723_v2 }
  0x59   : > { %1489 = vmatpush3.bf16.msra.mxu0 %v1616_v38 }
  0x5a   : > { %1490 = vmatprep.subr.bf16.mxu0 %v1723_v2 }
  0x5d   : > { %1491 = vmatpush3.bf16.msra.mxu0 %v1617_v39 }
  0x5e   : > { %1492 = vmatprep.subr.bf16.mxu0 %v1723_v2 }
  0x61   : > { %1493 = vmatpush3.bf16.msra.mxu0 %v1618_v40 }
  0x62   : > { %1494 = vmatprep.subr.bf16.mxu0 %v1723_v2 }
  0x65   : > { %1495 = vmatpush3.bf16.msra.mxu0 %v1619_v41 }
  0x66   : > { %1496 = vmatprep.subr.bf16.mxu0 %v1723_v2 }
  0x69   : > { %1497 = vmatpush3.bf16.msra.mxu0 %v1620_v42 }
  0x6a   : > { %1498 = vmatprep.subr.bf16.mxu0 %v1723_v2 }
  0x6d   : > { %1499 = vmatpush3.bf16.msra.mxu0 %v1621_v43 }
  0x70   : > { %1501 = vmatmul.mubr.bf16.vlgmr.msra.gmra.mxu0 %v619_v44 }
 0x10f   : > { %v837_v22 = vpop.f32.mrf.mxu1 }
 0x110   : > { %v838_v23 = vadd.f32 %v1377_v20, %v837_v22  ;;  %v726_v24 = vpop.f32.mrf.mxu0 }
 0x111   : > { %v727_v25 = vadd.f32 %v1368_v21, %v726_v24  ;;  %v1482_v26 = vpop.f32.mrf.mxu1 }
 0x112   : > { %v956_v27 = vpack.c.bf16 %v838_v23, %v838_v23  ;;  %v1462_v28 = vpop.f32.mrf.mxu0 }
 0x113   : > { %v840_v29 = vpop.f32.mrf.mxu1  ;;  %v954_v31 = vmul.f32 0.17677669, %v727_v25 }
 0x114   : > { %v971_v30 = vsel %vm966_vm1, %v956_v27, 0  ;;  %v729_v32 = vpop.f32.mrf.mxu0 }
 0x115   : > { %v1483_v33 = vpop.f32.mrf.mxu1  ;;  %1505 = vmatpush3.bf16.xpose.msra.mxu1 %v971_v30  ;;  %v955_v35 = vpack.c.bf16 %v954_v31, %v954_v31 }
 0x116   : > { %v1463_v34 = vpop.f32.mrf.mxu0  ;;  %1510 = vmatprep.subr.bf16.mxu1 %v1723_v2 }
 0x11c   : > { %1507 = vmatmul.mubr.msk.bf16.vlgmr.msra.gmra.mxu1 %vm966_vm1, %v955_v35 }
 0x11d   : > { %1512 = vmatprep.mubr.msk.bf16.mxu1 %vm1724_vm0, %v1723_v2 }
 0x130   : > { %v948_v63 = vpop.f32.mrf.mxu0 }
 0x131   : > { %v949_v0 = vadd.f32 %v1386_v62, %v948_v63 }
 0x132   : > { %v1502_v1 = vpop.f32.mrf.mxu0 }
 0x133   : > { %v957_v3 = vpack.c.bf16 %v949_v0, %v949_v0 }
 0x134   : > { %v951_v4 = vpop.f32.mrf.mxu0 }
 0x135   : > { %v1031_v5 = vsel %vm1029_vm4, %v957_v3, 0 }
 0x136   : > { %v1503_v6 = vpop.f32.mrf.mxu0  ;;  %1511 = vmatpush3.bf16.msra.mxu1 %v1031_v5 }
 0x137   : > { %1516 = vmatprep.subr.bf16.mxu1 %v1723_v2 }
 0x1dc   : > { %v1007_v51 = vpop.f32.mrf.mxu1 }
 0x1dd   : > { %v1008_v52 = vadd.f32 %v1007_v51, %v964_v50 }
 0x1de   : > { %v1508_v53 = vpop.f32.mrf.mxu1 }
 0x1df   : > { %v1014_v54 = vsel %vm1013_vm3, %v1008_v52, -inf }
 0x1e0   : > { %1015 = vmax.xlane.f32.xlu0 %v1014_v54  ;;  %v1010_v55 = vpop.f32.mrf.mxu1 }
 0x1e2   : > { %v1509_v56 = vpop.f32.mrf.mxu1 }
 0x269   : > { %v1016_v57 = vpop.xlane.xlu0 %1015 }
 0x26a   : > { %v1017_v58 = vsub.f32 %v1008_v52, %v1016_v57 }
 0x26c   : > { %v1018_v59 = vmul.f32 1.442695, %v1017_v58 }
 0x26e   : > { %1624 = vpow2.f32 %v1018_v59 }
 0x27b   : > { %v1625_v60 = vpop.eup %1624 }
 0x27c   : > { %v1020_v61 = vsel %vm1013_vm3, %v1625_v60, 0.0 }
 0x27d   : > { %1021 = vadd.xlane.f32.xlu0 %v1020_v61 }
 0x306   : > { %v1022_v7 = vpop.xlane.xlu0 %1021 }
 0x307   : > { %1626 = vrcp.f32 %v1022_v7 }
 0x314   : > { %v1627_v8 = vpop.eup %1626 }
 0x315   : > { %v1024_v9 = vmul.f32 %v1627_v8, %v1625_v60 }
 0x317   : > { %v1025_v11 = vpack.c.bf16 %v1024_v9, %v1024_v9 }
 0x319   : > { %1513 = vmatmul.mubr.msk.bf16.vlgmr.msra.gmra.mxu1 %vm1013_vm3, %v1025_v11 }
 0x31a   : > { %1517 = vmatpush3.bf16.msra.mxu1 %v1622_v10  ;;  %1520 = vmatprep.mubr.msk.bf16.mxu1 %vm1724_vm0, %v1723_v2 }
 0x31b   : > { %1518 = vmatprep.subr.bf16.mxu1 %v1723_v2 }
 0x31e   : > { %1519 = vmatpush3.bf16.msra.mxu1 %v1623_v12 }
 0x3d9   : > { %v1067_v13 = vpop.f32.mrf.mxu1 }
 0x3da   : > { %v1074_v14 = vpack.c.bf16 %v1067_v13, %v1067_v13 }
 0x3db   : > { %v1514_v15 = vpop.f32.mrf.mxu1 }
 0x3dc   : > { %1521 = vmatmul.mubr.msk.bf16.vlgmr.msra.gmra.mxu1 %vm966_vm1, %v1074_v14 }
 0x3dd   : > { %v1070_v16 = vpop.f32.mrf.mxu1 }
 0x3df   : > { %v1515_v17 = vpop.f32.mrf.mxu1 }
 0x49c   : > { %v1128_v19 = vpop.f32.mrf.mxu1 }
 0x49d   : > { %v1134_v20 = vadd.f32 %v1128_v19, %v1073_v18 }
 0x49e   : > { %v1522_v21 = vpop.f32.mrf.mxu1  ;;  %1139 = sbr.rel (%p1400_p1) target bundleno = 1194 (0x4aa), region = 76 }
 0x49f   : > { %1135 = vst [vmem:[#allocation2] sm:$0xff] %v1134_v20 }
 0x4a0   : > { %v1131_v22 = vpop.f32.mrf.mxu1 }
 0x4a2   : > { %v1523_v23 = vpop.f32.mrf.mxu1 }
 0x4a3   : > { %v1401_v24 = vld [vmem:[%s2143_s18] ss:$0 sm:$0xff] }
 0x4a6   : > { %v1140_v2 = vld [vmem:[#allocation2] sm:$0xff] }
 0x4a7   : > { %v1148_v25 = vadd.f32 %v1401_v24, %v1140_v2 }
 0x4a9   : > { %1149 = vst [vmem:[%s563_s27] sm:$0xff] %v1148_v25 }
 0x4aa PF: > { %s2144_s26 = sld [smem:[#allocation9_spill]]  ;;  %s1165_s12 = sshll.u32 %s563_s27, 4  ;;  %s1166_s12 = int_to_ptr.vmem [resolvable:$true] %s1165_s12 }
 0x4ab   : > { %s2145_s28 = sld [smem:[#allocation7_spill]]  ;;  %s1628_s22 = scalar_lea.vmem %s1166_s12, 128 }
 0x4ac   : > { %s2147_s20 = sld [smem:[#allocation21_spill]]  ;;  %p1629_p2 = scmp.ne.s32.totalorder %s1166_s12, %s1628_s22 }
 0x4ad   : > { %s1725_s15 = smov [#allocation3]  }
 0x4ae   : > { %p1630_p4 = pnand %p1629_p2, %p1840_p3  ;;  %s1632_s23 = sshll.u32 %s1725_s15, 4  ;;  %s1633_s23 = int_to_ptr.vmem [resolvable:$false] %s1632_s23 }
 0x4af   : > { %s1634_s16 = scalar_lea.vmem %s1633_s23, 256  ;;  %p1635_p6 = scmp.lt.s32.totalorder %s1166_s12, %s1633_s23 }
 0x4b0   : > { %s1403_s13 = sshll.u32 %s2144_s26, 7  ;;  %p1631_p5 = pneg %p1630_p4 }
 0x4b1   : > { %s2148_s14 = sand.u32 1, %s2145_s28   ;;  %p1636_p7 = scmp.lt.s32.totalorder %s1634_s16, %s1628_s22 }
 0x4b2   : > { %s1163_s24 = scalar_lea.hbm %s2147_s20, %s1403_s13  ;;  %s1151_s3 = scalar_lea.sflag [#allocation4], %s2148_s14 }
 0x4b3   : > { %p1637_p8 = por %p1636_p7, %p1635_p6 }
 0x4b5   : > { %p1638_p10 = pnand %p1637_p8, %p1631_p5 }
 0x4b7   : > { %1641 = shalt.err (!%p1638_p10)
}
 0x4b8   : > { %s1642_s21 = scalar_lea.hbm %s1163_s24, 128  ;;  %s1646_s30 = scalar_lea.hbm %s2147_s20, 256 }
 0x4b9   : > { %p1643_p11 = scmp.ne.s32.totalorder %s1163_s24, %s1642_s21  ;;  %p1647_p0 = scmp.lt.s32.totalorder %s1163_s24, %s2147_s20 }
 0x4ba   : > { %p1648_p1 = scmp.lt.s32.totalorder %s1646_s30, %s1642_s21 }
 0x4bb   : > { %p1644_p12 = pnand %p1643_p11, %p1840_p3 }
 0x4bc   : > { %p1649_p2 = por %p1648_p1, %p1647_p0 }
 0x4bd   : > { %p1645_p13 = pneg %p1644_p12 }
 0x4bf   : > { %p1650_p4 = pnand %p1649_p2, %p1645_p13 }
 0x4c1   : > { %1653 = shalt.err (!%p1650_p4)
}
 0x4c2   : > { %1524 = dma.vmem_to_hbm [thread:$0]  (%p1840_p3), %s1166_s12, 128, %s1163_s24, %s1151_s3  }
 0x4c3 PF: > { %s2149_s18 = sld [smem:[#allocation12_spill]] }
 0x4c4   : > { %s2150_s26 = sld [smem:[#allocation6_spill]] }
 0x4c9   : > { %p1530_p5 = scmp.ge.s32.totalorder %s2149_s18, 2 }
 0x4ca   : > { %s1177_s13 = sand.u32 1, %s2150_s26  }
 0x4cb   : > { %p1527_p6 = pnand %p1530_p5, %p1850_p9  ;;  %s1178_s11 = scalar_lea.sflag [#allocation4], %s1177_s13 }
 0x4cd   : > { %p1528_p7 = pneg %p1527_p6 }
 0x4cf   : > { %1687 = dma.done.wait (%p1528_p7), %s1178_s11, 128  }
 0x4d0   : > { %1689 = vsyncadd (%p1528_p7), %s1178_s11, 4294967168  ;;  %s25_s28 = sadd.s32 1, %s2149_s18   ;;  %s2152_s21 = sld [smem:[#allocation7_spill]] }
 0x4d1   : > { %p22_p8 = scmp.ge.s32.totalorder %s25_s28, 10   ;;  %s2153_s22 = sld [smem:[#allocation8_spill]] }
 0x4d2   : > { %s2154_s23 = sld [smem:[#allocation17_spill]] }
 0x4d3   : > { %s2155_s24 = sld [smem:[#allocation10_spill]]  ;;  %24 = sbr.rel (!%p22_p8) target bundleno = 10 (0xa), region = 141 }
 0x4d4   : > { %s2156_s25 = sld [smem:[#allocation11_spill]] }
 0x4d5   : > { %s2157_s26 = sld [smem:[#allocation13_spill]] }
 0x4d6   : > { %s2158_s27 = sld [smem:[#allocation15_spill]] }
 0x4d8   :  { %1183 = vsyncpa [#allocation4], 1 }
 0x4d9   :  { %1185 = vsyncpa [#allocation4 + $0x1], 1 }

</bundles_post_ra>
